<compile_context>
chip_gen: v7x
topology: tpu7x:2x2x1
jax: 0.10.0
libtpu: 0.0.40
codegen_flags: <defaults>
</compile_context>

<pallas_src>
import functools
import math

import jax
import jax.numpy as jnp
from jax.experimental import pallas as pl
from jax.experimental.pallas import tpu as pltpu


# ------------------------------ tiling helpers ------------------------------

def _choose_tile(dim, target, align):
    """Largest multiple of `align` <= target that evenly divides `dim`, else full dim."""
    if dim <= target:
        return dim
    t = (target // align) * align
    while t >= align:
        if dim % t == 0:
            return t
        t -= align
    return dim


def _heads_per_block(h, d_k):
    """Pack heads so the per-block lane width (hb*d_k) is 128-aligned or full d_model."""
    if d_k % 128 == 0:
        return 1
    if 128 % d_k == 0:
        hb = 128 // d_k
        if h % hb == 0:
            return hb
    return h  # fall back to all heads -> block width == d_model (always legal)


# ------------------------------ linear kernels ------------------------------

def _linear_kernel(x_ref, w_ref, b_ref, o_ref, acc_ref, *, k_axis):
    """One (tm, tn) output tile; accumulates over the k grid axis in f32 VMEM."""
    @pl.when(pl.program_id(k_axis) == 0)
    def _():
        acc_ref[...] = jnp.zeros_like(acc_ref)

    acc_ref[...] += jnp.dot(x_ref[...], w_ref[...],
                            preferred_element_type=jnp.float32)

    @pl.when(pl.program_id(k_axis) == pl.num_programs(k_axis) - 1)
    def _():
        o_ref[...] = (acc_ref[...] + b_ref[...]).astype(o_ref.dtype)


def pallas_linear(x2d, w_t, b, *, tm=256, tn=256, tk=512):
    """x2d: (M, K), w_t: (K, N), b: (N,) -> (M, N) computing x @ w_t + b."""
    M, K = x2d.shape
    N = w_t.shape[1]
    tm = _choose_tile(M, tm, 8)
    tn = _choose_tile(N, tn, 128)
    tk = _choose_tile(K, tk, 128)
    kernel = functools.partial(_linear_kernel, k_axis=2)
    return pl.pallas_call(
        kernel,
        out_shape=jax.ShapeDtypeStruct((M, N), x2d.dtype),
        grid=(M // tm, N // tn, K // tk),
        in_specs=[
            pl.BlockSpec((tm, tk), lambda i, j, k: (i, k)),
            pl.BlockSpec((tk, tn), lambda i, j, k: (k, j)),
            pl.BlockSpec((1, tn), lambda i, j, k: (0, j)),
        ],
        out_specs=pl.BlockSpec((tm, tn), lambda i, j, k: (i, j)),
        scratch_shapes=[pltpu.VMEM((tm, tn), jnp.float32)],
        compiler_params=pltpu.CompilerParams(
            dimension_semantics=("parallel", "parallel", "arbitrary")),
    )(x2d, w_t, b.reshape(1, N))


def pallas_linear_batched(x3, w3, b3, *, tm=256, tn=256, tk=512):
    """Fused/batched projection: x3 (G,M,K), w3 (G,K,N), b3 (G,1,N) -> (G,M,N)."""
    G, M, K = x3.shape
    N = w3.shape[2]
    tm = _choose_tile(M, tm, 8)
    tn = _choose_tile(N, tn, 128)
    tk = _choose_tile(K, tk, 128)
    kernel = functools.partial(_linear_kernel, k_axis=3)
    return pl.pallas_call(
        kernel,
        out_shape=jax.ShapeDtypeStruct((G, M, N), x3.dtype),
        grid=(G, M // tm, N // tn, K // tk),
        in_specs=[
            pl.BlockSpec((None, tm, tk), lambda g, i, j, k: (g, i, k)),
            pl.BlockSpec((None, tk, tn), lambda g, i, j, k: (g, k, j)),
            pl.BlockSpec((None, 1, tn), lambda g, i, j, k: (g, 0, j)),
        ],
        out_specs=pl.BlockSpec((None, tm, tn), lambda g, i, j, k: (g, i, j)),
        scratch_shapes=[pltpu.VMEM((tm, tn), jnp.float32)],
        compiler_params=pltpu.CompilerParams(
            dimension_semantics=("parallel", "parallel", "parallel", "arbitrary")),
    )(x3, w3, b3)


# ----------------------------- attention kernel -----------------------------

def _attention_kernel(qkv_ref, bias_ref, o_ref, *, heads, d_k):
    # qkv_ref: (3, S, heads*d_k)  bias_ref: (S, S)  o_ref: (S, heads*d_k)
    scale = 1.0 / math.sqrt(d_k)
    q2 = qkv_ref[0] * scale          # fold 1/sqrt(d_k) into Q (S*d_k ops, not S*S)
    k2 = qkv_ref[1]
    v2 = qkv_ref[2]
    bias = bias_ref[...]             # additive mask bias: 0 or -1e9 (no cmp+select)

    outs = []
    for hh in range(heads):          # static unroll over the packed heads
        sl = slice(hh * d_k, (hh + 1) * d_k)
        qh, kh, vh = q2[:, sl], k2[:, sl], v2[:, sl]

        # Contract the last dims directly — no explicit K transpose (XLU) work.
        s = jax.lax.dot_general(qh, kh, (((1,), (1,)), ((), ())),
                                preferred_element_type=jnp.float32)      # (S, S)
        s = s + bias

        # Numerically stable softmax along the key axis.
        m = jnp.max(s, axis=-1, keepdims=True)
        p = jnp.exp(s - m)
        denom = jnp.sum(p, axis=-1, keepdims=True)
        # approx=True would move this to the EUP slot at ~1e-4 accuracy cost.
        p = p * pl.reciprocal(denom, approx=False)

        outs.append(jnp.dot(p, vh, preferred_element_type=jnp.float32))  # (S, d_k)

    # One lane-dense, full-width store for the whole head block.
    o_ref[...] = jnp.concatenate(outs, axis=-1).astype(o_ref.dtype)


def pallas_attention(qkv, bias, h, d_k):
    """qkv: (3, B, S, d_model); bias: (B, S, S) additive -> (B, S, d_model)."""
    _, B, S, d_model = qkv.shape
    hb = _heads_per_block(h, d_k)
    n_hblk = h // hb
    hbw = hb * d_k
    kernel = functools.partial(_attention_kernel, heads=hb, d_k=d_k)
    return pl.pallas_call(
        kernel,
        out_shape=jax.ShapeDtypeStruct((B, S, d_model), qkv.dtype),
        grid=(B, n_hblk),
        in_specs=[
            # slice the packed-head column block straight out of the fused QKV
            pl.BlockSpec((3, None, S, hbw), lambda b, i: (0, b, 0, i)),
            pl.BlockSpec((None, S, S), lambda b, i: (b, 0, 0)),
        ],
        # write directly into the (B, S, d_model) layout -> no output transpose
        out_specs=pl.BlockSpec((None, S, hbw), lambda b, i: (b, 0, i)),
        compiler_params=pltpu.CompilerParams(
            dimension_semantics=("parallel", "parallel")),
    )(qkv, bias)


# ------------------------------ module wrapper -------------------------------

def init_mha_params(key, d_model):
    """4 nn.Linear(d_model, d_model) layers (PyTorch convention y = x @ W.T + b)."""
    params = []
    bound = 1.0 / math.sqrt(d_model)
    for _ in range(4):
        kw, kb, key = jax.random.split(key, 3)
        w = jax.random.uniform(kw, (d_model, d_model), jnp.float32, -bound, bound)
        b = jax.random.uniform(kb, (d_model,), jnp.float32, -bound, bound)
        params.append((w, b))
    return params


def multi_head_attention(params, h, query, key, value, mask=None):
    """Mirrors MultiHeadAttention.forward (eval mode)."""
    B, S, d_model = query.shape
    assert d_model % h == 0
    d_k = d_model // h
    (wq, bq), (wk, bk), (wv, bv), (wo, bo) = params

    # Fused Q/K/V projection: one batched tiled matmul producing (3, B*S, d_model)
    # directly in the layout the attention kernel reads (no head split/transpose).
    # NOTE: f32 is kept throughout to match the PyTorch module; casting the MXU
    # operands to bf16 is a further throughput knob if tolerance allows.
    x3 = jnp.stack([query, key, value], axis=0).reshape(3, B * S, d_model)
    w3 = jnp.stack([wq.T, wk.T, wv.T], axis=0)            # (3, d_model, d_model)
    b3 = jnp.stack([bq, bk, bv], axis=0)[:, None, :]      # (3, 1, d_model)
    qkv = pallas_linear_batched(x3, w3, b3)               # (3, B*S, d_model)
    qkv = qkv.reshape(3, B, S, d_model)

    # Precompute the additive attention bias once (0 where allowed, -1e9 masked).
    if mask is None:
        bias = jnp.zeros((B, S, S), jnp.float32)
    else:
        bias = jnp.where(mask == 0, jnp.float32(-1e9), jnp.float32(0.0))
        bias = jnp.broadcast_to(bias, (B, S, S)).astype(jnp.float32)

    x = pallas_attention(qkv, bias, h, d_k)               # (B, S, d_model)

    out = pallas_linear(x.reshape(B * S, d_model), wo.T, bo)
    return out.reshape(B, S, d_model)


def reference_mha(params, h, query, key, value, mask=None):
    """Pure-JAX reference for verification (matches the PyTorch module)."""
    B, S, d_model = query.shape
    d_k = d_model // h
    (wq, bq), (wk, bk), (wv, bv), (wo, bo) = params

    def proj(x, w, b):
        return (x @ w.T + b).reshape(B, S, h, d_k).transpose(0, 2, 1, 3)

    q, k, v = proj(query, wq, bq), proj(key, wk, bk), proj(value, wv, bv)
    scores = jnp.einsum("bhqd,bhkd->bhqk", q, k) / math.sqrt(d_k)
    if mask is not None:
        scores = jnp.where(mask[:, None, :, :] == 0, -1e9, scores)
    p = jax.nn.softmax(scores, axis=-1)
    x = jnp.einsum("bhqk,bhkd->bhqd", p, v)
    x = x.transpose(0, 2, 1, 3).reshape(B, S, d_model)
    return x @ wo.T + bo


# ----------------------------------- main ------------------------------------

if __name__ == "__main__":
    B, S, d_model, h = 2, 8, 32, 4

    root = jax.random.PRNGKey(0)
    kq, kk, kv, kp = jax.random.split(root, 4)
    query = jax.random.normal(kq, (B, S, d_model), jnp.float32)
    key_in = jax.random.normal(kk, (B, S, d_model), jnp.float32)
    value = jax.random.normal(kv, (B, S, d_model), jnp.float32)

    # causal-style mask: 0 means "masked"
    mask = jnp.broadcast_to(jnp.tril(jnp.ones((S, S), jnp.float32)), (B, S, S))

    params = init_mha_params(kp, d_model)

    out = multi_head_attention(params, h, query, key_in, value, mask=mask)
    out = jax.block_until_ready(out)

    ref = reference_mha(params, h, query, key_in, value, mask=mask)
    assert out.shape == (B, S, d_model)
    assert jnp.allclose(out, ref, atol=1e-3, rtol=1e-3), "mismatch vs reference"

    print("KERNEL_OK")
</pallas_src>

<mosaic_0001>
module attributes {stable_mosaic.version = 11 : i64} {
  func.func @_linear_kernel(%arg0: i32, %arg1: i32, %arg2: i32, %arg3: i32, %arg4: memref<1x16x32xf32, #tpu.memory_space<vmem>>, %arg5: memref<1x32x32xf32, #tpu.memory_space<vmem>>, %arg6: memref<1x1x32xf32, #tpu.memory_space<vmem>>, %arg7: memref<1x16x32xf32, #tpu.memory_space<vmem>>, %arg8: memref<16x32xf32, #tpu.memory_space<vmem>>) attributes {dimension_semantics = [#tpu.dimension_semantics<parallel>, #tpu.dimension_semantics<parallel>, #tpu.dimension_semantics<parallel>, #tpu.dimension_semantics<arbitrary>], iteration_bounds = array<i64: 3, 1, 1, 1>, scalar_prefetch = 0 : i64, scratch_operands = 1 : i64, tpu.core_type = #tpu.core_type<tc>, window_params = [{transform_indices = @transform_0, window_bounds = array<i64: 1, 16, 32>}, {transform_indices = @transform_1, window_bounds = array<i64: 1, 32, 32>}, {transform_indices = @transform_2, window_bounds = array<i64: 1, 1, 32>}, {transform_indices = @transform_3, window_bounds = array<i64: 1, 16, 32>}]} {
    %c0_i32 = arith.constant 0 : i32
    %0 = arith.cmpi eq, %arg3, %c0_i32 : i32
    %1 = arith.extui %0 : i1 to i32
    %c0_i32_0 = arith.constant 0 : i32
    %2 = arith.cmpi ne, %1, %c0_i32_0 : i32
    scf.if %2 {
      %cst_12 = arith.constant 0.000000e+00 : f32
      %14 = vector.broadcast %cst_12 : f32 to vector<16x32xf32>
      %c0_13 = arith.constant 0 : index
      %c0_14 = arith.constant 0 : index
      %15 = vector.load %arg8[%c0_13, %c0_14] : memref<16x32xf32, #tpu.memory_space<vmem>>, vector<16x32xf32>
      tpu.vector_store %arg8[%c0_13, %c0_14], %14 {strides = array<i32>} : memref<16x32xf32, #tpu.memory_space<vmem>>, vector<16x32xf32>,
    } else {
    }
    %c0 = arith.constant 0 : index
    %c0_1 = arith.constant 0 : index
    %3 = vector.load %arg8[%c0, %c0_1] : memref<16x32xf32, #tpu.memory_space<vmem>>, vector<16x32xf32>
    %c0_2 = arith.constant 0 : index
    %c0_3 = arith.constant 0 : index
    %c0_4 = arith.constant 0 : index
    %4 = vector.load %arg4[%c0_2, %c0_3, %c0_4] : memref<1x16x32xf32, #tpu.memory_space<vmem>>, vector<1x16x32xf32>
    %5 = vector.shape_cast %4 : vector<1x16x32xf32> to vector<16x32xf32>
    %c0_5 = arith.constant 0 : index
    %c0_6 = arith.constant 0 : index
    %c0_7 = arith.constant 0 : index
    %6 = vector.load %arg5[%c0_5, %c0_6, %c0_7] : memref<1x32x32xf32, #tpu.memory_space<vmem>>, vector<1x32x32xf32>
    %7 = vector.shape_cast %6 : vector<1x32x32xf32> to vector<32x32xf32>
    %cst = arith.constant dense<0.000000e+00> : vector<16x32xf32>
    %8 = tpu.matmul %5, %7, %cst {dimension_numbers = #tpu.dot_dimension_numbers<[1], [0], [0], [1], [0, 0, 1, 1], [], []>} : vector<16x32xf32>, vector<32x32xf32>, vector<16x32xf32> -> vector<16x32xf32>
    %9 = arith.addf %3, %8 : vector<16x32xf32>
    %c0_8 = arith.constant 0 : index
    %c0_9 = arith.constant 0 : index
    %10 = vector.load %arg8[%c0_8, %c0_9] : memref<16x32xf32, #tpu.memory_space<vmem>>, vector<16x32xf32>
    tpu.vector_store %arg8[%c0_8, %c0_9], %9 {strides = array<i32>} : memref<16x32xf32, #tpu.memory_space<vmem>>, vector<16x32xf32>,
    %c0_i32_10 = arith.constant 0 : i32
    %11 = arith.cmpi eq, %arg3, %c0_i32_10 : i32
    %12 = arith.extui %11 : i1 to i32
    %c0_i32_11 = arith.constant 0 : i32
    %13 = arith.cmpi ne, %12, %c0_i32_11 : i32
    scf.if %13 {
      %c0_12 = arith.constant 0 : index
      %c0_13 = arith.constant 0 : index
      %14 = vector.load %arg8[%c0_12, %c0_13] : memref<16x32xf32, #tpu.memory_space<vmem>>, vector<16x32xf32>
      %c0_14 = arith.constant 0 : index
      %c0_15 = arith.constant 0 : index
      %c0_16 = arith.constant 0 : index
      %15 = vector.load %arg6[%c0_14, %c0_15, %c0_16] : memref<1x1x32xf32, #tpu.memory_space<vmem>>, vector<1x1x32xf32>
      %16 = vector.shape_cast %15 : vector<1x1x32xf32> to vector<1x32xf32>
      %17 = vector.broadcast %16 : vector<1x32xf32> to vector<16x32xf32>
      %18 = arith.addf %14, %17 : vector<16x32xf32>
      %c0_17 = arith.constant 0 : index
      %c0_18 = arith.constant 0 : index
      %c0_19 = arith.constant 0 : index
      %19 = vector.load %arg7[%c0_17, %c0_18, %c0_19] : memref<1x16x32xf32, #tpu.memory_space<vmem>>, vector<1x16x32xf32>
      %20 = vector.shape_cast %19 : vector<1x16x32xf32> to vector<16x32xf32>
      %21 = vector.shape_cast %18 : vector<16x32xf32> to vector<1x16x32xf32>
      tpu.vector_store %arg7[%c0_17, %c0_18, %c0_19], %21 {strides = array<i32>} : memref<1x16x32xf32, #tpu.memory_space<vmem>>, vector<1x16x32xf32>,
    } else {
    }
    return
  }
  func.func @transform_0(%arg0: i32, %arg1: i32, %arg2: i32, %arg3: i32) -> (i32, i32, i32) {
    %c0_i32 = arith.constant 0 : i32
    return %arg0, %arg1, %arg3 : i32, i32, i32
  }
  func.func @transform_1(%arg0: i32, %arg1: i32, %arg2: i32, %arg3: i32) -> (i32, i32, i32) {
    %c0_i32 = arith.constant 0 : i32
    return %arg0, %arg3, %arg2 : i32, i32, i32
  }
  func.func @transform_2(%arg0: i32, %arg1: i32, %arg2: i32, %arg3: i32) -> (i32, i32, i32) {
    %c0_i32 = arith.constant 0 : i32
    %c0_i32_0 = arith.constant 0 : i32
    return %arg0, %c0_i32, %arg2 : i32, i32, i32
  }
  func.func @transform_3(%arg0: i32, %arg1: i32, %arg2: i32, %arg3: i32) -> (i32, i32, i32) {
    %c0_i32 = arith.constant 0 : i32
    return %arg0, %arg1, %arg2 : i32, i32, i32
  }
}

</mosaic_0001>

<bundles_post_ra>
// kernel: tpu_custom_call.1
= control target key start
LH: loop header
LB: loop body
LE: loop exit
PB: predicated region body
PF: predicated region fallthrough
CT: control target
= control target key end

     0   :  { %8 = vsyncpa [#allocation4], 0  ;;  %s1113_s0 = inlined_call_operand.hbm [shape: f32[3,16,32], index: 0, kind: input, shape index: {}]   ;;  %s1114_s1 = inlined_call_operand.hbm [shape: f32[3,32,32], index: 1, kind: input, shape index: {}]   ;;  %s1115_s2 = inlined_call_operand.vmem [shape: f32[3,1,32], index: 2, kind: input, shape index: {}]   ;;  %s1116_s3 = inlined_call_operand.hbm [shape: f32[3,16,32], index: 3, kind: output, shape index: {}]  }
   0x1   :  { %10 = vsyncpa [#allocation4 + $0x1], 0 }
   0x2   :  { %11 = vsyncpa [#allocation7], 0 }
   0x3   :  { %13 = vsyncpa [#allocation7 + $0x1], 0 }
   0x4   :  { %14 = vsyncpa [#allocation5], 0 }
   0x5   :  { %16 = vsyncpa [#allocation5 + $0x1], 0  ;;  %s867_s12 = smov 0   ;;  %s869_s13 = smov 0  }
   0x6   :  { %s871_s14 = smov 0   ;;  %s873_s15 = smov 0  }
   0x7   :  { %s875_s16 = smov 0   ;;  %s877_s17 = smov 0  }
   0x8 LB: > { %s569_s18 = sadd.s32 4294967295, %s837_s17   ;;  %s570_s19 = sadd.s32 4294967294, %s837_s17   ;;  %s837_s17 = sphi %s877_s17, %s22_s17   ;;  %s833_s16 = sphi %s875_s16, %s1133_s16   ;;  %s829_s15 = sphi %s873_s15, %s1132_s15   ;;  %s825_s14 = sphi %s871_s14, %s1131_s14   ;;  %s821_s13 = sphi %s869_s13, %s1130_s13   ;;  %s817_s12 = sphi %s867_s12, %s1129_s12  }
   0x9   : > { %s48_s20 = sadd.s32 1, %s833_s16  ;;  %s59_s21 = sadd.s32 1, %s825_s14 }
   0xa   : > { %p50_p0 = scmp.ge.s32.totalorder %s48_s20, 3  ;;  %p66_p1 = scmp.ne.s32.totalorder %s825_s14, %s821_s13 }
   0xb   : > { %p67_p2 = scmp.eq.s32.totalorder %s837_s17, 0  ;;  %p72_p3 = scmp.ne.s32.totalorder %s821_s13, %s817_s12 }
   0xc   : > { %s1135_s20 = smov (%p50_p0, %s48_s20), 0  ;;  %p73_p5 = scmp.eq.s32.totalorder %s569_s18, 0 }
   0xd   : > { %p908_p4 = por %p67_p2, %p66_p1  ;;  %s52_s23 = ssub.s32 %s833_s16, %s1135_s20 }
   0xe   : > { %p158_p6 = scmp.eq.s32.totalorder %s569_s18, 2  ;;  %p57_p7 = scmp.eq.s32.totalorder %s52_s23, 0 }
   0xf   : > { %p914_p8 = por %p73_p5, %p72_p3  ;;  %p164_p10 = scmp.eq.s32.totalorder %s570_s19, 2 }
  0x10   : > { %p918_p9 = por %p158_p6, %p66_p1  ;;  %p636_p12 = scmp.lt.s32.totalorder %s837_s17, 3 }
  0x11   : > { %s1120_s24 = scalar_select %p914_p8, 1, 0 }
  0x12   : > { %s1121_s25 = scalar_select %p918_p9, 1, 0 }
  0x13   : > { %s923_s26 = scalar_select %p57_p7, %s825_s14, %s59_s21  }
  0x14   : > { %p925_p11 = por %p164_p10, %p72_p3  ;;  %s931_s28 = sand.u32 1, %s825_s14  }
  0x15   : > { %s573_s29 = sshll.u32 %s931_s28, 4  ;;  %s591_s30 = sshll.u32 %s833_s16, 8 }
  0x16   : > { %s1122_s27 = scalar_select %p925_p11, 1, 0 }
  0x17   : > { %s938_s6 = scalar_lea.hbm %s1113_s0, %s591_s30  ;;  %s188_s7 = scalar_lea.vmem [#allocation3], %s573_s29 }
  0x18   : > { %s198_s8 = sshll.u32 %s188_s7, 4  ;;  %p944_p13 = pnand %p636_p12, %p908_p4  ;;  %s940_s8 = int_to_ptr.vmem [resolvable:$true] %s198_s8 }
  0x19   : > { %s185_s10 = scalar_lea.sflag [#allocation4], %s931_s28  ;;  %s691_s11 = scalar_lea.hbm %s938_s6, 256 }
  0x1a   : > { %p692_p1 = scmp.ne.s32.totalorder %s938_s6, %s691_s11  ;;  %p693_p2 = pneg %p944_p13 }
  0x1b   : > { %s696_s21 = scalar_lea.hbm %s1113_s0, 768  ;;  %p697_p4 = scmp.lt.u32.totalorder %s938_s6, %s1113_s0 }
  0x1c   : > { %p694_p3 = pnand %p693_p2, %p692_p1  ;;  %p698_p6 = scmp.lt.u32.totalorder %s696_s21, %s691_s11 }
  0x1d   : > { %p700_p10 = scmp.lt.u32.totalorder %s691_s11, %s938_s6 }
  0x1e   : > { %p695_p5 = pneg %p694_p3  ;;  %p699_p7 = por %p698_p6, %p697_p4 }
  0x20   : > { %p701_p12 = por %p700_p10, %p699_p7 }
  0x22   : > { %p702_p0 = pnand %p701_p12, %p695_p5 }
  0x24   : > { %705 = shalt.err (!%p702_p0)
}
  0x25   : > { %s706_s29 = scalar_lea.vmem %s940_s8, 256  ;;  %s839_s30 = smov [#allocation3]  }
  0x26   : > { %p707_p1 = scmp.ne.s32.totalorder %s940_s8, %s706_s29  ;;  %s711_s4 = sshll.u32 %s839_s30, 4  ;;  %s712_s4 = int_to_ptr.vmem [resolvable:$false] %s711_s4 }
  0x27   : > { %s713_s5 = scalar_lea.vmem %s712_s4, 512  ;;  %p714_p9 = scmp.lt.s32.totalorder %s940_s8, %s712_s4 }
  0x28   : > { %p709_p3 = pnand %p707_p1, %p693_p2  ;;  %p715_p4 = scmp.lt.s32.totalorder %s713_s5, %s706_s29 }
  0x2a   : > { %p710_p11 = pneg %p709_p3  ;;  %p716_p6 = por %p715_p4, %p714_p9 }
  0x2c   : > { %p717_p7 = pnand %p716_p6, %p710_p11 }
  0x2e   : > { %720 = shalt.err (!%p717_p7)
}
  0x2f   : > { %s840_s7 = smov 128   ;;  %s841_s11 = smov 8  }
  0x30   : > { %628 = dma.hbm_to_vmem [thread:$0]  (!%p944_p13), %s938_s6, 256, %s940_s8, %s185_s10, %s840_s7, %s840_s7, %s841_s11  }
  0x31   : > { %p239_p9 = scmp.lt.s32.totalorder %s837_s17, 4  ;;  %s576_s18 = sshll.u32 %s931_s28, 5 }
  0x32   : > { %s592_s19 = sshll.u32 %s833_s16, 9  ;;  %p1124_p11 = scmp.ge.s32.totalorder %s837_s17, 1 }
  0x33   : > { %s992_s29 = scalar_lea.hbm %s1114_s1, %s592_s19  ;;  %s212_s30 = scalar_lea.vmem [#allocation6], %s576_s18 }
  0x34   : > { %p985_p0 = pnand %p1124_p11, %p239_p9  ;;  %s222_s4 = sshll.u32 %s212_s30, 4  ;;  %s994_s4 = int_to_ptr.vmem [resolvable:$true] %s222_s4 }
  0x35   : > { %s209_s6 = scalar_lea.sflag [#allocation7], %s931_s28  ;;  %s721_s8 = scalar_lea.hbm %s992_s29, 512 }
  0x36   : > { %p722_p5 = scmp.ne.s32.totalorder %s992_s29, %s721_s8  ;;  %s726_s19 = scalar_lea.hbm %s1114_s1, 1536 }
  0x37   : > { %p727_p1 = scmp.lt.u32.totalorder %s992_s29, %s1114_s1  ;;  %p728_p3 = scmp.lt.u32.totalorder %s726_s19, %s721_s8 }
  0x38   : > { %p724_p10 = pnand %p722_p5, %p693_p2  ;;  %p730_p6 = scmp.lt.u32.totalorder %s721_s8, %s992_s29 }
  0x39   : > { %p729_p4 = por %p728_p3, %p727_p1 }
  0x3a   : > { %p725_p12 = pneg %p724_p10 }
  0x3b   : > { %p731_p7 = por %p730_p6, %p729_p4 }
  0x3d   : > { %p732_p9 = pnand %p731_p7, %p725_p12 }
  0x3f   : > { %735 = shalt.err (!%p732_p9)
}
  0x40   : > { %s736_s18 = scalar_lea.vmem %s994_s4, 512  ;;  %s842_s30 = smov [#allocation6]  }
  0x41   : > { %p737_p11 = scmp.ne.s32.totalorder %s994_s4, %s736_s18  ;;  %s741_s10 = sshll.u32 %s842_s30, 4  ;;  %s742_s10 = int_to_ptr.vmem [resolvable:$false] %s741_s10 }
  0x42   : > { %s743_s5 = scalar_lea.vmem %s742_s10, 1024  ;;  %p744_p8 = scmp.lt.s32.totalorder %s994_s4, %s742_s10 }
  0x43   : > { %p739_p5 = pnand %p737_p11, %p693_p2  ;;  %p745_p1 = scmp.lt.s32.totalorder %s743_s5, %s736_s18 }
  0x45   : > { %p740_p10 = pneg %p739_p5  ;;  %p746_p3 = por %p745_p1, %p744_p8 }
  0x47   : > { %p747_p4 = pnand %p746_p3, %p740_p10 }
  0x49   : > { %750 = shalt.err (!%p747_p4)
}
  0x4a   : > { %631 = dma.hbm_to_vmem [thread:$0]  (!%p944_p13), %s992_s29, 512, %s994_s4, %s209_s6, %s840_s7, %s840_s7, %s841_s11  }
  0x4b   : > { %243 = sbr.rel (%p985_p0) target bundleno = 337 (0x151), region = 32  ;;  %s1028_s8 = sand.u32 (!%p985_p0), 1, %s821_s13  }
  0x4c   : > { %s580_s19 = sshll.u32 (!%p985_p0), %s1028_s8, 4  ;;  %s246_s9 = scalar_lea.sflag (!%p985_p0), [#allocation4], %s1028_s8 }
  0x4d   : > { %s249_s22 = scalar_lea.vmem (!%p985_p0), [#allocation3], %s580_s19  ;;  %p1126_p8 = scmp.ne.s32.totalorder (!%p985_p0), %s1120_s24, 0 }
  0x52   : > { %804 = dma.done.wait (%p1126_p8), %s246_s9, 256  }
  0x53   : > { %806 = vsyncadd (%p1126_p8), %s246_s9, 4294967040  ;;  %s581_s28 = sshll.u32 %s1028_s8, 5  ;;  %s255_s7 = scalar_lea.sflag [#allocation7], %s1028_s8 }
  0x54   : > { %s258_s11 = scalar_lea.vmem [#allocation6], %s581_s28 }
  0x55   : > { %808 = dma.done.wait (%p1126_p8), %s255_s7, 512  }
  0x56   : > { %810 = vsyncadd (%p1126_p8), %s255_s7, 4294966784  ;;  %vm305_vm0 = vcmask 261120   ;;  %v843_v0 = vmov 0.0   ;;  %v312_v1 = vld [vmem:[%s258_s11] sm:$0xff]  ;;  %v313_v2 = vld [vmem:[%s258_s11 + $0x8] sm:$0xff]  ;;  %p294_p13 = scmp.lt.s32.totalorder %s829_s15, 2 }
  0x57   : > { %307 = vst.msk [vmem:[#allocation2 + $0x8] sm:$0xff] %vm305_vm0, %v843_v0  ;;  %306 = vst.msk [vmem:[#allocation2] sm:$0xff] %vm305_vm0, %v843_v0  ;;  %v314_v3 = vld [vmem:[%s258_s11 + $0x10] sm:$0xff]  ;;  %v611_v4 = vpack.c.bf16 %v313_v2, %v312_v1  ;;  %v315_v5 = vld [vmem:[%s258_s11 + $0x18] sm:$0xff]  ;;  %s593_s6 = sshll.u32 %s829_s15, 8  ;;  %s291_s23 = scalar_lea.vmem [#allocation8], %s580_s19 }
  0x58   : > { %v310_v6 = vld [vmem:[%s249_s22] sm:$0xff]  ;;  %v615_v7 = vpack.c.bf16 %v315_v5, %v314_v3  ;;  %v311_v8 = vld [vmem:[%s249_s22 + $0x8] sm:$0xff]  ;;  %s295_s24 = scalar_select %p294_p13, %s829_s15, 2 }
  0x59   : > { %608 = vmatprep.mubr.msk.f32.mxu0 %vm305_vm0, %v310_v6  ;;  %612 = vmatprep.subr.bf16.mxu0 %v611_v4  ;;  %s435_s18 = sshll.u32 %s291_s23, 4  ;;  %s1061_s5 = scalar_lea.hbm %s1116_s3, %s593_s6  ;;  %s1063_s18 = int_to_ptr.vmem [resolvable:$true] %s435_s18 }
  0x5a   : > { %614 = vmatpush3.bf16.msra.mxu0 %v611_v4  ;;  %s299_s4 = scalar_lea.vmem %s1115_s2, %s295_s24  ;;  %s419_s15 = scalar_lea.sflag [#allocation5], %s1028_s8 }
  0x5b   : > { %616 = vmatprep.subr.bf16.mxu0 %v615_v7  ;;  %v585_v15 = vld [vmem:[%s299_s4] ss:$0 sm:$0xff]  ;;  %s751_s19 = scalar_lea.vmem %s1063_s18, 256  ;;  %p1127_p0 = scmp.ne.s32.totalorder %s1121_s25, 0 }
  0x5c   : > { %p752_p2 = scmp.ne.s32.totalorder %s1063_s18, %s751_s19  ;;  %s844_s9 = smov [#allocation8]  }
  0x5d   : > { %s755_s22 = sshll.u32 %s844_s9, 4  ;;  %s756_s22 = int_to_ptr.vmem [resolvable:$false] %s755_s22 }
  0x5e   : > { %618 = vmatpush3.bf16.msra.mxu0 %v615_v7  ;;  %v309_v9 = vld [vmem:[#allocation2 + $0x8] sm:$0xff]  ;;  %v308_v10 = vld [vmem:[#allocation2] sm:$0xff]  ;;  %p753_p12 = pnand %p752_p2, %p1127_p0  ;;  %s757_s28 = scalar_lea.vmem %s756_s22, 512 }
  0x5f   : > { %p758_p7 = scmp.lt.s32.totalorder %s1063_s18, %s756_s22  ;;  %p759_p9 = scmp.lt.s32.totalorder %s757_s28, %s751_s19 }
  0x60   : > { %p754_p6 = pneg %p753_p12 }
  0x61   : > { %609 = vmatmul.mubr.msk.f32.vlgmr.msra.gmra.mrb[0].mxu0 %vm305_vm0, %v311_v8  ;;  %p760_p11 = por %p759_p9, %p758_p7 }
  0x63   : > { %p761_p5 = pnand %p760_p11, %p754_p6 }
 0x134   : > { %v610_v11 = vpop.f32.mrb[0].mxu0 }
 0x135   : > { %v399_v12 = vadd.f32 %v610_v11, %v309_v9  ;;  %v389_v13 = vpop.f32.mrb[1].mxu0 }
 0x136   : > { %v398_v14 = vadd.f32 %v389_v13, %v308_v10 }
 0x137   : > { %401 = vst.msk [vmem:[#allocation2 + $0x8] sm:$0xff] %vm305_vm0, %v399_v12 }
 0x138   : > { %400 = vst.msk [vmem:[#allocation2] sm:$0xff] %vm305_vm0, %v398_v14 }
 0x13e   : > { %v406_v16 = vld [vmem:[#allocation2 + $0x8] sm:$0xff] }
 0x13f   : > { %v405_v17 = vld [vmem:[#allocation2] sm:$0xff]  ;;  %v415_v18 = vadd.f32 %v585_v15, %v406_v16 }
 0x140   : > { %v414_v19 = vadd.f32 %v585_v15, %v405_v17 }
 0x141   : > { %417 = vst.msk [vmem:[%s291_s23 + $0x8] sm:$0xff] %vm305_vm0, %v415_v18 }
 0x142   : > { %416 = vst.msk [vmem:[%s291_s23] sm:$0xff] %vm305_vm0, %v414_v19 }
 0x143   : > { %764 = shalt.err (!%p761_p5)
}
 0x144   : > { %s765_s7 = scalar_lea.hbm %s1061_s5, 256  ;;  %s769_s21 = scalar_lea.hbm %s1116_s3, 768 }
 0x145   : > { %p766_p10 = scmp.ne.s32.totalorder %s1061_s5, %s765_s7  ;;  %p770_p4 = scmp.lt.u32.totalorder %s1061_s5, %s1116_s3 }
 0x146   : > { %p771_p8 = scmp.lt.u32.totalorder %s769_s21, %s765_s7  ;;  %p773_p2 = scmp.lt.u32.totalorder %s765_s7, %s1061_s5 }
 0x147   : > { %p767_p1 = pnand %p766_p10, %p1127_p0 }
 0x148   : > { %p772_p13 = por %p771_p8, %p770_p4 }
 0x149   : > { %p768_p3 = pneg %p767_p1 }
 0x14a   : > { %p774_p12 = por %p773_p2, %p772_p13 }
 0x14c   : > { %p775_p6 = pnand %p774_p12, %p768_p3 }
 0x14e   : > { %778 = shalt.err (!%p775_p6)
}
 0x14f   : > { %s845_s6 = smov 128   ;;  %s846_s23 = smov 8  }
 0x150   : > { %623 = dma.vmem_to_hbm [thread:$0]  (%p1127_p0), %s1063_s18, 256, %s1061_s5, %s419_s15, %s845_s6, %s845_s6, %s846_s23  }
 0x151 PF: > { %p637_p7 = scmp.ge.s32.totalorder %s837_s17, 2  ;;  %s450_s30 = sand.u32 1, %s817_s12  }
 0x152   : > { %p1128_p9 = scmp.ne.s32.totalorder %s1122_s27, 0  ;;  %s451_s10 = scalar_lea.sflag [#allocation5], %s450_s30 }
 0x154   : > { %p633_p11 = pnand %p637_p7, %p1128_p9 }
 0x156   : > { %812 = dma.done.wait (!%p633_p11), %s451_s10, 256  }
 0x157   : > { %814 = vsyncadd (!%p633_p11), %s451_s10, 4294967040  ;;  %s22_s17 = sadd.s32 1, %s837_s17   ;;  %s1129_s12 = smov %s821_s13 }
 0x158   : > { %p19_p5 = scmp.ge.s32.totalorder %s22_s17, 5   ;;  %s1130_s13 = smov %s825_s14 }
 0x159   : > { %s1131_s14 = smov %s923_s26  ;;  %s1132_s15 = smov %s833_s16 }
 0x15a   : > { %s1133_s16 = smov %s1135_s20  ;;  %21 = sbr.rel (!%p19_p5) target bundleno = 8 (0x8), region = 101 }
 0x161   :  { %456 = vsyncpa [#allocation4], 1 }
 0x162   :  { %458 = vsyncpa [#allocation4 + $0x1], 1 }
 0x163   :  { %459 = vsyncpa [#allocation7], 1 }
 0x164   :  { %461 = vsyncpa [#allocation7 + $0x1], 1 }
 0x165   :  { %462 = vsyncpa [#allocation5], 1 }
 0x166   :  { %464 = vsyncpa [#allocation5 + $0x1], 1 }

</bundles_post_ra>
